<compile_context>
chip_gen: v7x
topology: tpu7x:2x2x1
jax: 0.10.0
libtpu: 0.0.40
codegen_flags: <defaults>
</compile_context>

<pallas_src>
import functools

import numpy as np
import jax
import jax.numpy as jnp
from jax import lax
from jax.experimental import pallas as pl
from jax.experimental.pallas import tpu as pltpu

_LANE = 128
_SUBLANE_I8 = 32          # int8 packs 32 rows per vreg -> keep tm a multiple of 32


def _norm_mask_kernel(rij_ref, r_ref, mask_ref, *, n, cutoff, tm):
    # rij_ref: (3, TM, 128) f32   r_ref: (TM, 128) f32   mask_ref: (TM, 128) int8
    x = rij_ref[0]
    y = rij_ref[1]
    z = rij_ref[2]
    r = jnp.sqrt(x * x + y * y + z * z)        # pure VPU mul/add + EUP sqrt (slack units)
    r_ref[...] = r

    # Fused cutoff compare.  Zero-padded tail rows would give rij = 0 <= cutoff,
    # so mask them out explicitly against the true pair count n.
    row = lax.broadcasted_iota(jnp.int32, (tm, _LANE), 0)
    lane = lax.broadcasted_iota(jnp.int32, (tm, _LANE), 1)
    flat = (pl.program_id(0) * tm + row) * _LANE + lane
    valid = flat < n
    mask = jnp.logical_and(r <= jnp.float32(cutoff), valid)   # '<=' matches the torch module
    mask_ref[...] = jnp.where(mask, 1, 0).astype(jnp.int8)


def _pairwise_norm_mask(rij_blocks: jax.Array, tm: int, n: int, cutoff: float):
    """rij_blocks: (3, M, 128) f32 -> ((M,128) f32 norms, (M,128) int8 mask)."""
    _, m, lane = rij_blocks.shape
    assert lane == _LANE and m % tm == 0 and tm % _SUBLANE_I8 == 0

    # double-buffered per-block footprint: in (3x f32) + rij (f32) + mask (i8), + headroom
    block_bytes = tm * _LANE * (3 * 4 + 4 + 1)
    vmem_limit = 2 * block_bytes + (4 << 20)

    kern = functools.partial(_norm_mask_kernel, n=n, cutoff=cutoff, tm=tm)
    return pl.pallas_call(
        kern,
        out_shape=(
            jax.ShapeDtypeStruct((m, _LANE), jnp.float32),
            jax.ShapeDtypeStruct((m, _LANE), jnp.int8),
        ),
        grid=(m // tm,),
        in_specs=[pl.BlockSpec((3, tm, _LANE), lambda i: (0, i, 0))],
        out_specs=(
            pl.BlockSpec((tm, _LANE), lambda i: (i, 0)),
            pl.BlockSpec((tm, _LANE), lambda i: (i, 0)),
        ),
        compiler_params=pltpu.CompilerParams(
            dimension_semantics=("parallel",),      # shard across v7x's two TCs
            vmem_limit_bytes=vmem_limit,
        ),
    )(rij_blocks)


@functools.partial(jax.jit, static_argnames=("cutoff", "capacity"))
def _device_compute(Rij, idx_i, idx_j, *, cutoff: float, capacity: int):
    """Device-side work: fused norm+mask (Pallas), count, nonzero (size=capacity), gathers."""
    n = Rij.shape[0]

    # Tile sizing: big blocks (cap 1024 rows ~ 1.5 MiB in) to amortize the fixed per-step
    # cost, but aim for >= ~4 grid steps so the "parallel" axis can be split across cores.
    rows = -(-n // _LANE)                                              # 128-wide rows
    tm = ((max(rows // 4, 1) + _SUBLANE_I8 - 1) // _SUBLANE_I8) * _SUBLANE_I8
    tm = max(_SUBLANE_I8, min(1024, tm))
    m = -(-rows // tm) * tm
    npad = m * _LANE

    # Layout plumbing: single fused transpose+pad copy (N,3) -> (3, M, 128).
    # TODO(synk): if the neighbor-list producer hands Rij over in SoA (3, N) layout this
    # copy (~1.5x the kernel's own HBM traffic) disappears entirely.
    rij_t = jnp.pad(Rij.astype(jnp.float32).T, ((0, 0), (0, npad - n)))
    rij_blocks = rij_t.reshape(3, m, _LANE)

    rij_pad, mask_pad = _pairwise_norm_mask(rij_blocks, tm, n, cutoff)
    rij = rij_pad.reshape(npad)[:n]
    mask = mask_pad.reshape(npad)[:n]              # padded tail already zeroed in-kernel

    count = jnp.sum(mask.astype(jnp.int32))
    cidx_full = jnp.nonzero(mask.astype(bool), size=capacity, fill_value=0)[0].astype(jnp.int32)

    Rij_s = jnp.take(Rij, cidx_full, axis=0)
    idx_i_s = jnp.take(idx_i, cidx_full, axis=0)
    idx_j_s = jnp.take(idx_j, cidx_full, axis=0)
    return rij, Rij_s, idx_i_s, idx_j_s, count


def filter_short_range(inputs: dict, short_range_cutoff: float, capacity: int | None = None) -> dict:
    """JAX/Pallas equivalent of FilterShortRange.forward.

    `capacity` bounds the static size of the compacted short-range arrays (default: all
    pairs); pass a realistic value to shrink the nonzero/gather traffic when selectivity
    is known to be low.
    """
    Rij = inputs["Rij"]          # (N, 3) float32
    idx_i = inputs["idx_i"]      # (N,)   int32
    idx_j = inputs["idx_j"]      # (N,)   int32

    n = Rij.shape[0]
    cap = n if capacity is None else min(int(capacity), n)

    rij, Rij_s, idx_i_s, idx_j_s, count = _device_compute(
        Rij, idx_i, idx_j, cutoff=float(short_range_cutoff), capacity=cap
    )

    # TODO(synk): torch.nonzero yields a dynamically sized tensor; this scalar host sync +
    # dynamic [:k] trim reproduces that contract.  Jitted pipelines should instead consume
    # the fixed-size (capacity,) compacted arrays plus the on-device `count` to avoid the
    # dispatch stall and per-unique-k retracing.
    k = min(int(count), cap)

    out = dict(inputs)
    out["Rij_lr"] = Rij
    out["idx_i_lr"] = idx_i
    out["idx_j_lr"] = idx_j
    out["Rij"] = Rij_s[:k]
    out["idx_i"] = idx_i_s[:k]
    out["idx_j"] = idx_j_s[:k]
    out["rij"] = rij             # kernel-computed norms (for verification)
    return out


if __name__ == "__main__":
    key = jax.random.PRNGKey(0)
    k1, k2, k3 = jax.random.split(key, 3)

    N = 64                                   # number of neighbor pairs
    cutoff = 1.5

    Rij = jax.random.normal(k1, (N, 3), dtype=jnp.float32) * 1.2
    idx_i = jax.random.randint(k2, (N,), 0, 16, dtype=jnp.int32)
    idx_j = jax.random.randint(k3, (N,), 0, 16, dtype=jnp.int32)

    inputs = {"Rij": Rij, "idx_i": idx_i, "idx_j": idx_j}
    out = filter_short_range(inputs, cutoff)
    jax.block_until_ready(out["Rij"])

    # reference check (plain JAX)
    rij_ref = jnp.linalg.norm(Rij, axis=-1)
    cidx_ref = jnp.nonzero(rij_ref <= cutoff)[0]
    assert np.allclose(np.asarray(out["rij"]), np.asarray(rij_ref), atol=1e-5)
    assert np.array_equal(np.asarray(out["Rij"]), np.asarray(Rij[cidx_ref]))
    assert np.array_equal(np.asarray(out["idx_i"]), np.asarray(idx_i[cidx_ref]))
    assert np.array_equal(np.asarray(out["idx_j"]), np.asarray(idx_j[cidx_ref]))
    assert np.array_equal(np.asarray(out["Rij_lr"]), np.asarray(Rij))
    assert np.array_equal(np.asarray(out["idx_i_lr"]), np.asarray(idx_i))
    assert np.array_equal(np.asarray(out["idx_j_lr"]), np.asarray(idx_j))

    print("KERNEL_OK")
</pallas_src>

<mosaic_0001>
module attributes {stable_mosaic.version = 11 : i64} {
  func.func private @main(%arg0: i32) attributes {dimension_semantics = [#tpu.dimension_semantics<core_parallel>], iteration_bounds = array<i64: 2>, tpu.core_type = #tpu.core_type<sc_scalar_subcore>, window_params = []} {
    return
  }
}

module attributes {stable_mosaic.version = 11 : i64} {
  func.func private @main(%arg0: i32) attributes {dimension_semantics = [#tpu.dimension_semantics<core_parallel>], iteration_bounds = array<i64: 2>, tpu.core_type = #tpu.core_type<sc_scalar_subcore>, window_params = []} {
    return
  }
}

module attributes {stable_mosaic.version = 11 : i64} {
  func.func @_norm_mask_kernel(%arg0: i32, %arg1: memref<3x32x128xf32, #tpu.memory_space<vmem>>, %arg2: memref<32x128xf32, #tpu.memory_space<vmem>>, %arg3: memref<32x128xi8, #tpu.memory_space<vmem>>) attributes {dimension_semantics = [#tpu.dimension_semantics<parallel>], iteration_bounds = array<i64: 1>, scalar_prefetch = 0 : i64, scratch_operands = 0 : i64, tpu.core_type = #tpu.core_type<tc>, window_params = [{transform_indices = @transform_0, window_bounds = array<i64: 3, 32, 128>}, {transform_indices = @transform_1, window_bounds = array<i64: 32, 128>}, {transform_indices = @transform_2, window_bounds = array<i64: 32, 128>}]} {
    %c0 = arith.constant 0 : index
    %c0_0 = arith.constant 0 : index
    %c0_1 = arith.constant 0 : index
    %0 = vector.load %arg1[%c0, %c0_0, %c0_1] : memref<3x32x128xf32, #tpu.memory_space<vmem>>, vector<1x32x128xf32>
    %1 = vector.shape_cast %0 : vector<1x32x128xf32> to vector<32x128xf32>
    %c1 = arith.constant 1 : index
    %c0_2 = arith.constant 0 : index
    %c0_3 = arith.constant 0 : index
    %2 = vector.load %arg1[%c1, %c0_2, %c0_3] : memref<3x32x128xf32, #tpu.memory_space<vmem>>, vector<1x32x128xf32>
    %3 = vector.shape_cast %2 : vector<1x32x128xf32> to vector<32x128xf32>
    %c2 = arith.constant 2 : index
    %c0_4 = arith.constant 0 : index
    %c0_5 = arith.constant 0 : index
    %4 = vector.load %arg1[%c2, %c0_4, %c0_5] : memref<3x32x128xf32, #tpu.memory_space<vmem>>, vector<1x32x128xf32>
    %5 = vector.shape_cast %4 : vector<1x32x128xf32> to vector<32x128xf32>
    %6 = arith.mulf %1, %1 : vector<32x128xf32>
    %7 = arith.mulf %3, %3 : vector<32x128xf32>
    %8 = arith.addf %6, %7 : vector<32x128xf32>
    %9 = arith.mulf %5, %5 : vector<32x128xf32>
    %10 = arith.addf %8, %9 : vector<32x128xf32>
    %11 = math.sqrt %10 : vector<32x128xf32>
    %c0_6 = arith.constant 0 : index
    %c0_7 = arith.constant 0 : index
    %12 = vector.load %arg2[%c0_6, %c0_7] : memref<32x128xf32, #tpu.memory_space<vmem>>, vector<32x128xf32>
    tpu.vector_store %arg2[%c0_6, %c0_7], %11 {strides = array<i32>} : memref<32x128xf32, #tpu.memory_space<vmem>>, vector<32x128xf32>,
    %13 = tpu.iota {dimensions = array<i32: 0>} : vector<32x128xi32>
    %14 = tpu.iota {dimensions = array<i32: 1>} : vector<32x128xi32>
    %c32_i32 = arith.constant 32 : i32
    %15 = arith.muli %arg0, %c32_i32 : i32
    %16 = vector.broadcast %15 : i32 to vector<32x128xi32>
    %17 = arith.addi %16, %13 : vector<32x128xi32>
    %c128_i32 = arith.constant 128 : i32
    %18 = vector.broadcast %c128_i32 : i32 to vector<32x128xi32>
    %19 = arith.muli %17, %18 : vector<32x128xi32>
    %20 = arith.addi %19, %14 : vector<32x128xi32>
    %c64_i32 = arith.constant 64 : i32
    %21 = vector.broadcast %c64_i32 : i32 to vector<32x128xi32>
    %22 = arith.cmpi slt, %20, %21 : vector<32x128xi32>
    %cst = arith.constant 1.500000e+00 : f32
    %23 = vector.broadcast %cst : f32 to vector<32x128xf32>
    %24 = arith.cmpf ole, %11, %23 : vector<32x128xf32>
    %25 = arith.andi %24, %22 : vector<32x128xi1>
    %c1_i32 = arith.constant 1 : i32
    %c0_i32 = arith.constant 0 : i32
    %26 = vector.broadcast %c1_i32 : i32 to vector<32x128xi32>
    %27 = vector.broadcast %c0_i32 : i32 to vector<32x128xi32>
    %28 = arith.select %25, %26, %27 : vector<32x128xi1>, vector<32x128xi32>
    %29 = arith.trunci %28 : vector<32x128xi32> to vector<32x128xi8>
    %c0_8 = arith.constant 0 : index
    %c0_9 = arith.constant 0 : index
    %30 = vector.load %arg3[%c0_8, %c0_9] : memref<32x128xi8, #tpu.memory_space<vmem>>, vector<32x128xi8>
    tpu.vector_store %arg3[%c0_8, %c0_9], %29 {strides = array<i32>} : memref<32x128xi8, #tpu.memory_space<vmem>>, vector<32x128xi8>,
    return
  }
  func.func @transform_0(%arg0: i32) -> (i32, i32, i32) {
    %c0_i32 = arith.constant 0 : i32
    %c0_i32_0 = arith.constant 0 : i32
    %c0_i32_1 = arith.constant 0 : i32
    return %c0_i32, %arg0, %c0_i32_0 : i32, i32, i32
  }
  func.func @transform_1(%arg0: i32) -> (i32, i32) {
    %c0_i32 = arith.constant 0 : i32
    %c0_i32_0 = arith.constant 0 : i32
    return %arg0, %c0_i32 : i32, i32
  }
  func.func @transform_2(%arg0: i32) -> (i32, i32) {
    %c0_i32 = arith.constant 0 : i32
    %c0_i32_0 = arith.constant 0 : i32
    return %arg0, %c0_i32 : i32, i32
  }
}

</mosaic_0001>

<bundles_post_ra>
// kernel: _device_compute.1
= control target key start
LH: loop header
LB: loop body
LE: loop exit
PB: predicated region body
PF: predicated region fallthrough
CT: control target
= control target key end

     0   :  { %v76_v3 = vlaneseq  ;;  %v150_v62 = vmov 0   ;;  %s231_s0 = inlined_call_operand.vmem [shape: f32[3,32,128], index: 0, kind: input, shape index: {}]   ;;  %s232_s1 = inlined_call_operand.vmem [shape: f32[32,128], index: 1, kind: output, shape index: {0}]   ;;  %s233_s2 = inlined_call_operand.vmem [shape: s8[32,128], index: 2, kind: output, shape index: {1}]  }
   0x1   :  { %v10_v0 = vld [vmem:[%s231_s0] sm:$0xff]  ;;  %v11_v7 = vld [vmem:[%s231_s0 + $0x8] sm:$0xff]  ;;  %v12_v13 = vld [vmem:[%s231_s0 + $0x10] sm:$0xff] }
   0x2   :  { %v133_v1 = vld [vmem:[%s231_s0 + $0x20] sm:$0xff]  ;;  %v24_v4 = vmul.f32 %v10_v0, %v10_v0  ;;  %v134_v8 = vld [vmem:[%s231_s0 + $0x28] sm:$0xff]  ;;  %v25_v10 = vmul.f32 %v11_v7, %v11_v7  ;;  %v135_v14 = vld [vmem:[%s231_s0 + $0x30] sm:$0xff]  ;;  %v26_v17 = vmul.f32 %v12_v13, %v12_v13  ;;  %v77_v20 = vshrl.u32 %v76_v3, 7 }
   0x3   :  { %v137_v2 = vld [vmem:[%s231_s0 + $0x40] sm:$0xff]  ;;  %v28_v5 = vmul.f32 %v133_v1, %v133_v1  ;;  %v138_v9 = vld [vmem:[%s231_s0 + $0x48] sm:$0xff]  ;;  %v29_v11 = vmul.f32 %v134_v8, %v134_v8  ;;  %v139_v15 = vld [vmem:[%s231_s0 + $0x50] sm:$0xff]  ;;  %v30_v22 = vmul.f32 %v135_v14, %v135_v14  ;;  %v82_v35 = vand.u32 127, %v76_v3 }
   0x4   :  { %v36_v6 = vmul.f32 %v137_v2, %v137_v2  ;;  %v37_v12 = vmul.f32 %v138_v9, %v138_v9  ;;  %v13_v18 = vld [vmem:[%s231_s0 + $0x18] sm:$0xff]  ;;  %v38_v24 = vmul.f32 %v139_v15, %v139_v15  ;;  %v78_v30 = vadd.s32 8, %v77_v20 }
   0x5   :  { %v32_v16 = vadd.f32 %v28_v5, %v24_v4  ;;  %v136_v19 = vld [vmem:[%s231_s0 + $0x38] sm:$0xff]  ;;  %v33_v21 = vadd.f32 %v29_v11, %v25_v10  ;;  %v34_v26 = vadd.f32 %v30_v22, %v26_v17  ;;  %v27_v27 = vmul.f32 %v13_v18, %v13_v18 }
   0x6   :  { %v31_v28 = vmul.f32 %v136_v19, %v136_v19  ;;  %v140_v29 = vld [vmem:[%s231_s0 + $0x58] sm:$0xff]  ;;  %v79_v34 = vadd.s32 16, %v77_v20  ;;  %v89_v36 = vmul.u32 128, %v77_v20  ;;  %v90_v37 = vmul.u32 128, %v78_v30 }
   0x7   :  { %v40_v23 = vadd.f32 %v36_v6, %v32_v16  ;;  %v41_v25 = vadd.f32 %v37_v12, %v33_v21  ;;  %v42_v31 = vadd.f32 %v38_v24, %v34_v26  ;;  %v39_v33 = vmul.f32 %v140_v29, %v140_v29 }
   0x8   :  { %v35_v32 = vadd.f32 %v31_v28, %v27_v27  ;;  %v91_v39 = vmul.u32 128, %v79_v34  ;;  %v80_v40 = vadd.s32 24, %v77_v20  ;;  %v93_v41 = vadd.s32 %v89_v36, %v82_v35 }
   0x9   :  { %142 = vrsqrt.f32 %v40_v23  ;;  %v94_v42 = vadd.s32 %v90_v37, %v82_v35  ;;  %vm46_vm0 = vcmp.eq.f32.partialorder %v40_v23, inf  ;;  %v49_v44 = vand.u32 2147483648, %v40_v23 }
   0xa   :  { %144 = vrsqrt.f32 %v41_v25  ;;  %v43_v38 = vadd.f32 %v39_v33, %v35_v32  ;;  %vm48_vm1 = vcmp.eq.f32.partialorder %v40_v23, 0.0  ;;  %vm53_vm2 = vcmp.eq.f32.partialorder %v41_v25, inf }
   0xb   :  { %146 = vrsqrt.f32 %v42_v31  ;;  %v56_v47 = vand.u32 2147483648, %v41_v25  ;;  %vm55_vm3 = vcmp.eq.f32.partialorder %v41_v25, 0.0  ;;  %v95_v49 = vadd.s32 %v91_v39, %v82_v35 }
   0xc   :  { %148 = vrsqrt.f32 %v43_v38  ;;  %v92_v50 = vmul.u32 128, %v80_v40  ;;  %vm97_vm4 = vcmp.lt.s32.totalorder %v93_v41, 64  ;;  %vm98_vm5 = vcmp.lt.s32.totalorder %v94_v42, 64 }
   0xd   :  { %vm60_vm6 = vcmp.eq.f32.partialorder %v42_v31, inf  ;;  %v63_v55 = vand.u32 2147483648, %v42_v31  ;;  %vm62_vm8 = vcmp.eq.f32.partialorder %v42_v31, 0.0  ;;  %vm99_vm11 = vcmp.lt.s32.totalorder %v95_v49, 64 }
   0xe   :  { %vm67_vm12 = vcmp.eq.f32.partialorder %v43_v38, inf  ;;  %v96_v58 = vadd.s32 %v92_v50, %v82_v35  ;;  %vm69_vm14 = vcmp.eq.f32.partialorder %v43_v38, 0.0  ;;  %v70_v61 = vand.u32 2147483648, %v43_v38 }
  0x13   :  { %v143_v43 = vpop.eup %142 }
  0x14   :  { %v145_v45 = vpop.eup %144  ;;  %v45_v46 = vmul.f32 %v143_v43, %v40_v23 }
  0x15   :  { %v52_v48 = vmul.f32 %v145_v45, %v41_v25  ;;  %v147_v52 = vpop.eup %146 }
  0x16   :  { %v47_v51 = vsel %vm46_vm0, %v40_v23, %v45_v46  ;;  %v59_v57 = vmul.f32 %v147_v52, %v42_v31  ;;  %v149_v59 = vpop.eup %148 }
  0x17   :  { %v50_v53 = vsel %vm48_vm1, %v49_v44, %v47_v51  ;;  %v54_v54 = vsel %vm53_vm2, %v41_v25, %v52_v48  ;;  %v66_v1 = vmul.f32 %v149_v59, %v43_v38  ;;  %vm100_vm1 = vcmp.lt.s32.totalorder %v96_v58, 64 }
  0x18   :  { %72 = vst [vmem:[%s232_s1] sm:$0xff] %v50_v53  ;;  %vm101_vm7 = vcmp.le.f32.partialorder %v50_v53, 1.5  ;;  %v57_v56 = vsel %vm55_vm3, %v56_v47, %v54_v54  ;;  %v61_v60 = vsel %vm60_vm6, %v42_v31, %v59_v57 }
  0x19   :  { %vm105_vm9 = vmand %vm101_vm7, %vm97_vm4  ;;  %73 = vst [vmem:[%s232_s1 + $0x8] sm:$0xff] %v57_v56  ;;  %vm102_vm10 = vcmp.le.f32.partialorder %v57_v56, 1.5  ;;  %v64_v0 = vsel %vm62_vm8, %v63_v55, %v61_v60  ;;  %v68_v5 = vsel %vm67_vm12, %v43_v38, %v66_v1 }
  0x1a   :  { %vm106_vm13 = vmand %vm102_vm10, %vm98_vm5  ;;  %v109_v63 = vsel %vm105_vm9, 1, %v150_v62  ;;  %74 = vst [vmem:[%s232_s1 + $0x10] sm:$0xff] %v64_v0  ;;  %vm103_vm15 = vcmp.le.f32.partialorder %v64_v0, 1.5  ;;  %v71_v7 = vsel %vm69_vm14, %v70_v61, %v68_v5 }
  0x1b   :  { %v113_v2 = vpack.c.b16 %v109_v63, %v109_v63  ;;  %v110_v3 = vsel %vm106_vm13, 1, %v150_v62  ;;  %vm107_vm0 = vmand %vm103_vm15, %vm99_vm11  ;;  %75 = vst [vmem:[%s232_s1 + $0x18] sm:$0xff] %v71_v7  ;;  %vm104_vm2 = vcmp.le.f32.partialorder %v71_v7, 1.5 }
  0x1c   :  { %v115_v4 = vpack.c.b16 %v110_v3, %v110_v3  ;;  %v111_v9 = vsel %vm107_vm0, 1, %v150_v62  ;;  %vm108_vm3 = vmand %vm104_vm2, %vm100_vm1 }
  0x1d   :  { %v114_v6 = vpack.c.b8 %v113_v2, %v113_v2  ;;  %v117_v10 = vpack.c.b16 %v111_v9, %v111_v9  ;;  %v112_v12 = vsel %vm108_vm3, 1, %v150_v62 }
  0x1e   :  { %v116_v8 = vpack.c.b8 %v115_v4, %v115_v4  ;;  %v119_v13 = vpack.c.b16 %v112_v12, %v112_v12 }
  0x1f   :  { %121 = vst [vmem:[%s233_s2] sm:$0x3] %v114_v6  ;;  %v118_v11 = vpack.c.b8 %v117_v10, %v117_v10 }
  0x20   :  { %122 = vst [vmem:[%s233_s2 + $0x2] sm:$0x3] %v116_v8  ;;  %v120_v14 = vpack.c.b8 %v119_v13, %v119_v13 }
  0x21   :  { %123 = vst [vmem:[%s233_s2 + $0x4] sm:$0x3] %v118_v11 }
  0x22   :  { %124 = vst [vmem:[%s233_s2 + $0x6] sm:$0x3] %v120_v14 }

</bundles_post_ra>
